<compile_context>
chip_gen: v7x
topology: tpu7x:2x2x1
jax: 0.10.0
libtpu: 0.0.40
codegen_flags: <defaults>
</compile_context>

<pallas_src>
import jax
import jax.numpy as jnp
from jax.experimental import pallas as pl
from jax.experimental.pallas import tpu as pltpu


K_IN = 784     # input features
H1 = 128       # fc1 width
H2 = 64        # fc2 width (real)
H2P = 128      # fc2 width padded to a full 128-lane vreg
C = 10         # classes (real)
CP = 128       # classes padded to a full 128-lane vreg


def _round_up(x, m):
    return (x + m - 1) // m * m


def mlp_kernel(x_ref, w1_ref, b1_ref, w2_ref, b2_ref, w3_ref, b3_ref, o_ref):
    # In-kernel cast of the f32 input tile to bf16 (VPU work hidden under DMA).
    x_bf = x_ref[...].astype(jnp.bfloat16)

    # fc1 + ReLU (dropout is identity at inference)
    h1 = jnp.dot(x_bf, w1_ref[...], preferred_element_type=jnp.float32)
    h1 = jnp.maximum(h1 + b1_ref[...], 0.0)

    # fc2 + ReLU (hidden 64 padded to 128 lanes; padded columns are exactly 0)
    h2 = jnp.dot(h1.astype(jnp.bfloat16), w2_ref[...],
                 preferred_element_type=jnp.float32)
    h2 = jnp.maximum(h2 + b2_ref[...], 0.0)

    # fc3: classes padded 10 -> 128; padded class columns carry bias -1e30 so
    # their exp underflows to exactly 0 in f32 and the log_softmax over the
    # real 10 classes is exact.
    logits = jnp.dot(h2.astype(jnp.bfloat16), w3_ref[...],
                     preferred_element_type=jnp.float32)
    logits = logits + b3_ref[...]

    # Stable log_softmax over the class axis, computed in f32.
    m = jnp.max(logits, axis=-1, keepdims=True)
    shifted = logits - m
    lse = jnp.log(jnp.sum(jnp.exp(shifted), axis=-1, keepdims=True))
    o_ref[...] = (shifted - lse).astype(o_ref.dtype)


def prepare_params(params):
    """One-time weight preprocessing (pad + bf16 cast), hoisted out of the
    per-call inference path."""
    w1, b1, w2, b2, w3, b3 = params

    w1_bf = w1.astype(jnp.bfloat16)                                  # (784, 128)
    b1_f = b1.reshape(1, -1).astype(jnp.float32)                     # (1, 128)

    w2_p = jnp.zeros((H1, H2P), jnp.bfloat16).at[:, :H2].set(
        w2.astype(jnp.bfloat16))                                     # (128, 128)
    b2_p = jnp.zeros((1, H2P), jnp.float32).at[:, :H2].set(
        b2.reshape(1, -1).astype(jnp.float32))                       # (1, 128)

    w3_p = jnp.zeros((H2P, CP), jnp.bfloat16).at[:H2, :C].set(
        w3.astype(jnp.bfloat16))                                     # (128, 128)
    b3_p = jnp.full((1, CP), -1e30, jnp.float32).at[:, :C].set(
        b3.reshape(1, -1).astype(jnp.float32))                       # (1, 128)

    return (w1_bf, b1_f, w2_p, b2_p, w3_p, b3_p)


def network_forward(x, prepared):
    """x: (B, 1, 28, 28) or (B, 784) float32. Returns (B, 10) f32 log-probs."""
    w1_bf, b1_f, w2_p, b2_p, w3_p, b3_p = prepared

    B = x.shape[0]
    x2d = x.reshape(B, -1).astype(jnp.float32)       # x.view(B, -1); stays f32
    K = x2d.shape[1]                                 # 784 (== full last dim)

    # Batch tile: large tiles amortize the ~0.35 us per-grid-step overhead; for
    # big batches pick TB so the grid has >= 2 steps (v7x has 2 TensorCores and
    # the batch axis is "parallel"), capped at 2048 rows (VMEM: f32 x tile is
    # ~6.4 MB per buffer at TB=2048, well inside the 32 MiB scoped limit below).
    if B > 256:
        TB = min(2048, _round_up(-(-B // 2), 256))
    else:
        TB = _round_up(B, 8)
    grid = (pl.cdiv(B, TB),)          # ragged last block handled by Pallas

    out = pl.pallas_call(
        mlp_kernel,
        out_shape=jax.ShapeDtypeStruct((B, CP), jnp.bfloat16),
        grid=grid,
        in_specs=[
            pl.BlockSpec((TB, K), lambda i: (i, 0)),       # batch-tiled raw x
            pl.BlockSpec(w1_bf.shape, lambda i: (0, 0)),   # resident weights
            pl.BlockSpec(b1_f.shape, lambda i: (0, 0)),
            pl.BlockSpec(w2_p.shape, lambda i: (0, 0)),
            pl.BlockSpec(b2_p.shape, lambda i: (0, 0)),
            pl.BlockSpec(w3_p.shape, lambda i: (0, 0)),
            pl.BlockSpec(b3_p.shape, lambda i: (0, 0)),
        ],
        out_specs=pl.BlockSpec((TB, CP), lambda i: (i, 0)),
        compiler_params=pltpu.CompilerParams(
            dimension_semantics=("parallel",),
            vmem_limit_bytes=32 * 1024 * 1024),   # covers v5e's 16 MiB default
    )(x2d, w1_bf, b1_f, w2_p, b2_p, w3_p, b3_p)

    # Slice off padded classes; return f32 log-probs (tiny (B,10) op).
    return out[:, :C].astype(jnp.float32)


def init_params(key):
    """Deterministic init mimicking nn.Linear shapes (stored as (in, out))."""
    k1, k2, k3, k4, k5, k6 = jax.random.split(key, 6)

    def linear(kw, kb, fan_in, fan_out):
        bound = 1.0 / jnp.sqrt(fan_in)
        w = jax.random.uniform(kw, (fan_in, fan_out), jnp.float32, -bound, bound)
        b = jax.random.uniform(kb, (1, fan_out), jnp.float32, -bound, bound)
        return w, b

    w1, b1 = linear(k1, k2, 784, 128)
    w2, b2 = linear(k3, k4, 128, 64)
    w3, b3 = linear(k5, k6, 64, 10)
    return (w1, b1, w2, b2, w3, b3)


def reference_forward(x, params):
    """Pure-JAX f32 reference of the PyTorch forward (dropout = identity)."""
    w1, b1, w2, b2, w3, b3 = params
    xf = x.reshape(x.shape[0], -1).astype(jnp.float32)
    h1 = jnp.maximum(xf @ w1 + b1, 0.0)
    h2 = jnp.maximum(h1 @ w2 + b2, 0.0)
    logits = h2 @ w3 + b3
    return jax.nn.log_softmax(logits, axis=-1)


if __name__ == "__main__":
    key = jax.random.PRNGKey(0)
    k_params, k_x = jax.random.split(key)

    params = init_params(k_params)
    prepared = prepare_params(params)     # hoisted, one-time weight prep

    # Small batch of MNIST-shaped inputs (B, 1, 28, 28) -> flattened to 784.
    B = 8
    x = jax.random.uniform(k_x, (B, 1, 28, 28), jnp.float32)

    out = network_forward(x, prepared)
    out = jax.block_until_ready(out)

    assert out.shape == (B, 10)

    # Sanity: rows of log_softmax must exp-sum to 1 (bf16-stored log-probs).
    row_sums = jnp.sum(jnp.exp(out), axis=1)
    assert bool(jnp.allclose(row_sums, 1.0, atol=2e-2))

    # Numerical check vs f32 reference (loose tol: bf16 activations/weights and
    # bf16 output storage).
    ref = reference_forward(x, params)
    assert bool(jnp.max(jnp.abs(out - ref)) < 1e-1)

    print("KERNEL_OK")
</pallas_src>

<mosaic_0001>
module attributes {stable_mosaic.version = 11 : i64} {
  func.func @mlp_kernel(%arg0: i32, %arg1: memref<8x784xf32, #tpu.memory_space<vmem>>, %arg2: memref<784x128xbf16, #tpu.memory_space<vmem>>, %arg3: memref<1x128xf32, #tpu.memory_space<vmem>>, %arg4: memref<128x128xbf16, #tpu.memory_space<vmem>>, %arg5: memref<1x128xf32, #tpu.memory_space<vmem>>, %arg6: memref<128x128xbf16, #tpu.memory_space<vmem>>, %arg7: memref<1x128xf32, #tpu.memory_space<vmem>>, %arg8: memref<8x128xbf16, #tpu.memory_space<vmem>>) attributes {dimension_semantics = [#tpu.dimension_semantics<parallel>], iteration_bounds = array<i64: 1>, scalar_prefetch = 0 : i64, scratch_operands = 0 : i64, tpu.core_type = #tpu.core_type<tc>, window_params = [{transform_indices = @transform_0, window_bounds = array<i64: 8, 784>}, {pipeline_mode = #tpu.pipeline_mode<synchronous>, transform_indices = @transform_1, window_bounds = array<i64: 784, 128>}, {pipeline_mode = #tpu.pipeline_mode<synchronous>, transform_indices = @transform_2, window_bounds = array<i64: 1, 128>}, {pipeline_mode = #tpu.pipeline_mode<synchronous>, transform_indices = @transform_3, window_bounds = array<i64: 128, 128>}, {pipeline_mode = #tpu.pipeline_mode<synchronous>, transform_indices = @transform_4, window_bounds = array<i64: 1, 128>}, {pipeline_mode = #tpu.pipeline_mode<synchronous>, transform_indices = @transform_5, window_bounds = array<i64: 128, 128>}, {pipeline_mode = #tpu.pipeline_mode<synchronous>, transform_indices = @transform_6, window_bounds = array<i64: 1, 128>}, {transform_indices = @transform_7, window_bounds = array<i64: 8, 128>}]} {
    %c0 = arith.constant 0 : index
    %c0_0 = arith.constant 0 : index
    %0 = vector.load %arg1[%c0, %c0_0] : memref<8x784xf32, #tpu.memory_space<vmem>>, vector<8x784xf32>
    %1 = arith.truncf %0 : vector<8x784xf32> to vector<8x784xbf16>
    %c0_1 = arith.constant 0 : index
    %c0_2 = arith.constant 0 : index
    %2 = vector.load %arg2[%c0_1, %c0_2] : memref<784x128xbf16, #tpu.memory_space<vmem>>, vector<784x128xbf16>
    %cst = arith.constant dense<0.000000e+00> : vector<8x128xf32>
    %3 = tpu.matmul %1, %2, %cst {dimension_numbers = #tpu.dot_dimension_numbers<[1], [0], [0], [1], [0, 0, 1, 1], [], []>} : vector<8x784xbf16>, vector<784x128xbf16>, vector<8x128xf32> -> vector<8x128xf32>
    %c0_3 = arith.constant 0 : index
    %c0_4 = arith.constant 0 : index
    %4 = vector.load %arg3[%c0_3, %c0_4] : memref<1x128xf32, #tpu.memory_space<vmem>>, vector<1x128xf32>
    %5 = vector.broadcast %4 : vector<1x128xf32> to vector<8x128xf32>
    %6 = arith.addf %3, %5 : vector<8x128xf32>
    %cst_5 = arith.constant 0.000000e+00 : f32
    %7 = vector.broadcast %cst_5 : f32 to vector<8x128xf32>
    %8 = arith.maximumf %6, %7 : vector<8x128xf32>
    %9 = arith.truncf %8 : vector<8x128xf32> to vector<8x128xbf16>
    %c0_6 = arith.constant 0 : index
    %c0_7 = arith.constant 0 : index
    %10 = vector.load %arg4[%c0_6, %c0_7] : memref<128x128xbf16, #tpu.memory_space<vmem>>, vector<128x128xbf16>
    %cst_8 = arith.constant dense<0.000000e+00> : vector<8x128xf32>
    %11 = tpu.matmul %9, %10, %cst_8 {dimension_numbers = #tpu.dot_dimension_numbers<[1], [0], [0], [1], [0, 0, 1, 1], [], []>} : vector<8x128xbf16>, vector<128x128xbf16>, vector<8x128xf32> -> vector<8x128xf32>
    %c0_9 = arith.constant 0 : index
    %c0_10 = arith.constant 0 : index
    %12 = vector.load %arg5[%c0_9, %c0_10] : memref<1x128xf32, #tpu.memory_space<vmem>>, vector<1x128xf32>
    %13 = vector.broadcast %12 : vector<1x128xf32> to vector<8x128xf32>
    %14 = arith.addf %11, %13 : vector<8x128xf32>
    %cst_11 = arith.constant 0.000000e+00 : f32
    %15 = vector.broadcast %cst_11 : f32 to vector<8x128xf32>
    %16 = arith.maximumf %14, %15 : vector<8x128xf32>
    %17 = arith.truncf %16 : vector<8x128xf32> to vector<8x128xbf16>
    %c0_12 = arith.constant 0 : index
    %c0_13 = arith.constant 0 : index
    %18 = vector.load %arg6[%c0_12, %c0_13] : memref<128x128xbf16, #tpu.memory_space<vmem>>, vector<128x128xbf16>
    %cst_14 = arith.constant dense<0.000000e+00> : vector<8x128xf32>
    %19 = tpu.matmul %17, %18, %cst_14 {dimension_numbers = #tpu.dot_dimension_numbers<[1], [0], [0], [1], [0, 0, 1, 1], [], []>} : vector<8x128xbf16>, vector<128x128xbf16>, vector<8x128xf32> -> vector<8x128xf32>
    %c0_15 = arith.constant 0 : index
    %c0_16 = arith.constant 0 : index
    %20 = vector.load %arg7[%c0_15, %c0_16] : memref<1x128xf32, #tpu.memory_space<vmem>>, vector<1x128xf32>
    %21 = vector.broadcast %20 : vector<1x128xf32> to vector<8x128xf32>
    %22 = arith.addf %19, %21 : vector<8x128xf32>
    %cst_17 = arith.constant dense<0xFF800000> : vector<8xf32>
    %23 = vector.multi_reduction <maximumf>, %22, %cst_17 [1] : vector<8x128xf32> to vector<8xf32>
    %24 = vector.shape_cast %23 : vector<8xf32> to vector<8x1xf32>
    %25 = vector.broadcast %24 : vector<8x1xf32> to vector<8x128xf32>
    %26 = arith.subf %22, %25 : vector<8x128xf32>
    %27 = math.exp %26 : vector<8x128xf32>
    %cst_18 = arith.constant dense<0.000000e+00> : vector<8xf32>
    %28 = vector.multi_reduction <add>, %27, %cst_18 [1] : vector<8x128xf32> to vector<8xf32>
    %29 = vector.shape_cast %28 : vector<8xf32> to vector<8x1xf32>
    %30 = math.log %29 : vector<8x1xf32>
    %31 = vector.broadcast %30 : vector<8x1xf32> to vector<8x128xf32>
    %32 = arith.subf %26, %31 : vector<8x128xf32>
    %33 = arith.truncf %32 : vector<8x128xf32> to vector<8x128xbf16>
    %c0_19 = arith.constant 0 : index
    %c0_20 = arith.constant 0 : index
    %34 = vector.load %arg8[%c0_19, %c0_20] : memref<8x128xbf16, #tpu.memory_space<vmem>>, vector<8x128xbf16>
    tpu.vector_store %arg8[%c0_19, %c0_20], %33 {strides = array<i32>} : memref<8x128xbf16, #tpu.memory_space<vmem>>, vector<8x128xbf16>,
    return
  }
  func.func @transform_0(%arg0: i32) -> (i32, i32) {
    %c0_i32 = arith.constant 0 : i32
    %c0_i32_0 = arith.constant 0 : i32
    return %arg0, %c0_i32 : i32, i32
  }
  func.func @transform_1(%arg0: i32) -> (i32, i32) {
    %c0_i32 = arith.constant 0 : i32
    %c0_i32_0 = arith.constant 0 : i32
    %c0_i32_1 = arith.constant 0 : i32
    return %c0_i32, %c0_i32_0 : i32, i32
  }
  func.func @transform_2(%arg0: i32) -> (i32, i32) {
    %c0_i32 = arith.constant 0 : i32
    %c0_i32_0 = arith.constant 0 : i32
    %c0_i32_1 = arith.constant 0 : i32
    return %c0_i32, %c0_i32_0 : i32, i32
  }
  func.func @transform_3(%arg0: i32) -> (i32, i32) {
    %c0_i32 = arith.constant 0 : i32
    %c0_i32_0 = arith.constant 0 : i32
    %c0_i32_1 = arith.constant 0 : i32
    return %c0_i32, %c0_i32_0 : i32, i32
  }
  func.func @transform_4(%arg0: i32) -> (i32, i32) {
    %c0_i32 = arith.constant 0 : i32
    %c0_i32_0 = arith.constant 0 : i32
    %c0_i32_1 = arith.constant 0 : i32
    return %c0_i32, %c0_i32_0 : i32, i32
  }
  func.func @transform_5(%arg0: i32) -> (i32, i32) {
    %c0_i32 = arith.constant 0 : i32
    %c0_i32_0 = arith.constant 0 : i32
    %c0_i32_1 = arith.constant 0 : i32
    return %c0_i32, %c0_i32_0 : i32, i32
  }
  func.func @transform_6(%arg0: i32) -> (i32, i32) {
    %c0_i32 = arith.constant 0 : i32
    %c0_i32_0 = arith.constant 0 : i32
    %c0_i32_1 = arith.constant 0 : i32
    return %c0_i32, %c0_i32_0 : i32, i32
  }
  func.func @transform_7(%arg0: i32) -> (i32, i32) {
    %c0_i32 = arith.constant 0 : i32
    %c0_i32_0 = arith.constant 0 : i32
    return %arg0, %c0_i32 : i32, i32
  }
}

</mosaic_0001>

<bundles_post_ra>
// kernel: tpu_custom_call.1
= control target key start
LH: loop header
LB: loop body
LE: loop exit
PB: predicated region body
PF: predicated region fallthrough
CT: control target
= control target key end

     0   :  { %12 = vsyncpa [#allocation3], 0  ;;  %s1460_s0 = inlined_call_operand.hbm [shape: f32[8,784], index: 0, kind: input, shape index: {}]   ;;  %s1461_s1 = inlined_call_operand.hbm [shape: bf16[784,128], index: 1, kind: input, shape index: {}]   ;;  %s1462_s2 = inlined_call_operand.vmem [shape: f32[1,128], index: 2, kind: input, shape index: {}]   ;;  %s1463_s3 = inlined_call_operand.hbm [shape: bf16[128,128], index: 3, kind: input, shape index: {}]   ;;  %s1464_s4 = inlined_call_operand.vmem [shape: f32[1,128], index: 4, kind: input, shape index: {}]   ;;  %s1465_s5 = inlined_call_operand.hbm [shape: bf16[128,128], index: 5, kind: input, shape index: {}]   ;;  %s1466_s6 = inlined_call_operand.vmem [shape: f32[1,128], index: 6, kind: input, shape index: {}]   ;;  %s1467_s7 = inlined_call_operand.hbm [shape: bf16[8,128], index: 7, kind: output, shape index: {}]  }
   0x1   :  { %13 = vsyncpa [#allocation6], 0 }
   0x2   :  { %14 = vsyncpa [#allocation9], 0 }
   0x3   :  { %15 = vsyncpa [#allocation4], 0  ;;  %s1310_s24 = smov [#allocation5]   ;;  %s1192_s28 = scalar_lea.hbm %s1461_s1, 6272 }
   0x4   :  { %s31_s25 = sshll.u32 %s1310_s24, 4  ;;  %p1193_p0 = scmp.ne.s32.totalorder %s1461_s1, %s1192_s28  ;;  %s32_s25 = int_to_ptr.vmem [resolvable:$true] %s31_s25 }
   0x5   :  { %p1196_p1 = scmp.lt.u32.totalorder %s1192_s28, %s1461_s1 }
   0x7   :  { %p1198_p2 = pnand %p1196_p1, %p1193_p0 }
   0x9   :  { %1201 = shalt.err (!%p1198_p2)
}
   0xa   :  { %s1202_s10 = scalar_lea.vmem %s32_s25, 6272  ;;  %p1207_p4 = scmp.lt.s32.totalorder %s32_s25, %s32_s25 }
   0xb   :  { %p1203_p3 = scmp.ne.s32.totalorder %s32_s25, %s1202_s10  ;;  %p1208_p5 = scmp.lt.s32.totalorder %s1202_s10, %s1202_s10 }
   0xd   :  { %p1209_p6 = por %p1208_p5, %p1207_p4 }
   0xf   :  { %p1210_p7 = pnand %p1209_p6, %p1203_p3 }
  0x11   :  { %1213 = shalt.err (!%p1210_p7)
}
  0x12   :  { %s1311_s11 = smov 64   ;;  %s1312_s12 = smov 4  }
  0x13   :  { %37 = dma.hbm_to_vmem [thread:$0]  %s1461_s1, 6272, %s32_s25, [#allocation6], %s1311_s11, %s1311_s11, %s1312_s12  }
  0x14   :  { %s1313_s15 = smov [#allocation2]   ;;  %s1314_s17 = smov [#allocation7]  }
  0x15   :  { %s22_s16 = sshll.u32 %s1313_s15, 4  ;;  %s45_s18 = sshll.u32 %s1314_s17, 4  ;;  %s23_s16 = int_to_ptr.vmem [resolvable:$true] %s22_s16  ;;  %s46_s18 = int_to_ptr.vmem [resolvable:$true] %s45_s18 }
  0x16   :  { %s1214_s21 = scalar_lea.hbm %s1460_s0, 896 }
  0x17   :  { %p1215_p8 = scmp.ne.s32.totalorder %s1460_s0, %s1214_s21  ;;  %p1218_p9 = scmp.lt.u32.totalorder %s1214_s21, %s1460_s0 }
  0x19   :  { %p1220_p10 = pnand %p1218_p9, %p1215_p8 }
  0x1b   :  { %1223 = shalt.err (!%p1220_p10)
}
  0x1c   :  { %s1224_s1 = scalar_lea.vmem %s23_s16, 896  ;;  %p1229_p12 = scmp.lt.s32.totalorder %s23_s16, %s23_s16 }
  0x1d   :  { %p1225_p11 = scmp.ne.s32.totalorder %s23_s16, %s1224_s1  ;;  %p1230_p13 = scmp.lt.s32.totalorder %s1224_s1, %s1224_s1 }
  0x1f   :  { %p1231_p0 = por %p1230_p13, %p1229_p12 }
  0x21   :  { %p1232_p1 = pnand %p1231_p0, %p1225_p11 }
  0x23   :  { %1235 = shalt.err (!%p1232_p1)
}
  0x24   :  { %25 = dma.hbm_to_vmem [thread:$0]  %s1460_s0, 896, %s23_s16, [#allocation3]  }
  0x25   :  { %s1236_s30 = scalar_lea.hbm %s1463_s3, 1024 }
  0x26   :  { %p1237_p2 = scmp.ne.s32.totalorder %s1463_s3, %s1236_s30  ;;  %p1240_p3 = scmp.lt.u32.totalorder %s1236_s30, %s1463_s3 }
  0x28   :  { %p1242_p4 = pnand %p1240_p3, %p1237_p2 }
  0x2a   :  { %1245 = shalt.err (!%p1242_p4)
}
  0x2b   :  { %s1246_s14 = scalar_lea.vmem %s46_s18, 1024  ;;  %p1251_p6 = scmp.lt.s32.totalorder %s46_s18, %s46_s18 }
  0x2c   :  { %p1247_p5 = scmp.ne.s32.totalorder %s46_s18, %s1246_s14  ;;  %p1252_p7 = scmp.lt.s32.totalorder %s1246_s14, %s1246_s14 }
  0x2e   :  { %p1253_p8 = por %p1252_p7, %p1251_p6 }
  0x30   :  { %p1254_p9 = pnand %p1253_p8, %p1247_p5 }
  0x32   :  { %1257 = shalt.err (!%p1254_p9)
}
  0x33   :  { %51 = dma.hbm_to_vmem [thread:$0]  %s1463_s3, 1024, %s46_s18, [#allocation6], %s1311_s11, %s1311_s11, %s1312_s12  }
  0x34   :  { %s1315_s16 = smov [#allocation8]   ;;  %s1258_s21 = scalar_lea.hbm %s1465_s5, 1024 }
  0x35   :  { %s59_s17 = sshll.u32 %s1315_s16, 4  ;;  %p1259_p10 = scmp.ne.s32.totalorder %s1465_s5, %s1258_s21  ;;  %s60_s17 = int_to_ptr.vmem [resolvable:$true] %s59_s17 }
  0x36   :  { %p1262_p11 = scmp.lt.u32.totalorder %s1258_s21, %s1465_s5 }
  0x38   :  { %p1264_p12 = pnand %p1262_p11, %p1259_p10 }
  0x3a   :  { %1267 = shalt.err (!%p1264_p12)
}
  0x3b   :  { %s1268_s1 = scalar_lea.vmem %s60_s17, 1024  ;;  %p1273_p0 = scmp.lt.s32.totalorder %s60_s17, %s60_s17 }
  0x3c   :  { %p1269_p13 = scmp.ne.s32.totalorder %s60_s17, %s1268_s1  ;;  %p1274_p1 = scmp.lt.s32.totalorder %s1268_s1, %s1268_s1 }
  0x3e   :  { %p1275_p2 = por %p1274_p1, %p1273_p0 }
  0x40   :  { %p1276_p3 = pnand %p1275_p2, %p1269_p13 }
  0x42   :  { %1279 = shalt.err (!%p1276_p3)
}
  0x43   :  { %65 = dma.hbm_to_vmem [thread:$0]  %s1465_s5, 1024, %s60_s17, [#allocation9], %s1311_s11, %s1311_s11, %s1312_s12  }
  0x44   :  { %1302 = dma.done.wait [#allocation3], 896  }
  0x45   :  { %1303 = vsyncadd [#allocation3], 4294966400 }
  0x46   :  { %1304 = dma.done.wait [#allocation6], 7296  }
  0x47   :  { %1305 = vsyncadd [#allocation6], 4294960000 }
  0x48   :  { %1306 = dma.done.wait [#allocation9], 1024  }
  0x49   :  { %1307 = vsyncadd [#allocation9], 4294966272  ;;  %v1123_v0 = vld [vmem:[#allocation5 + $0x40] sm:$0xff]   ;;  %v1127_v4 = vld [vmem:[#allocation5 + $0x48] sm:$0xff]   ;;  %v1316_v44 = vmov 0.0   ;;  %vm1317_vm0 = vmmov 0  }
  0x4a   :  { %v1124_v1 = vld [vmem:[#allocation5] sm:$0xff]   ;;  %982 = vmatprep.subr.bf16.mxu0 %v1123_v0  ;;  %v1128_v5 = vld [vmem:[#allocation5 + $0x8] sm:$0xff]   ;;  %v1131_v8 = vld [vmem:[#allocation5 + $0x50] sm:$0xff]   ;;  %vm494_vm1 = vcmask 130048  }
  0x4b   :  { %v1125_v2 = vld [vmem:[#allocation5 + $0xc0] sm:$0xff]   ;;  %983 = vmatpush3.bf16.msra.mxu0 %v1124_v1  ;;  %v1129_v6 = vld [vmem:[#allocation5 + $0xc8] sm:$0xff]   ;;  %v1132_v9 = vld [vmem:[#allocation5 + $0x10] sm:$0xff]  }
  0x4c   :  { %v1126_v3 = vld [vmem:[#allocation5 + $0x80] sm:$0xff]   ;;  %1004 = vmatprep.subr.bf16.mxu1 %v1125_v2  ;;  %984 = vmatprep.subr.bf16.mxu0 %v1127_v4  ;;  %v1130_v7 = vld [vmem:[#allocation5 + $0x88] sm:$0xff]   ;;  %v1133_v10 = vld [vmem:[#allocation5 + $0xd0] sm:$0xff]  }
  0x4d   :  { %1005 = vmatpush3.bf16.msra.mxu1 %v1126_v3  ;;  %v1134_v11 = vld [vmem:[#allocation5 + $0x90] sm:$0xff]   ;;  %v1135_v12 = vld [vmem:[#allocation5 + $0x58] sm:$0xff]   ;;  %v1139_v16 = vld [vmem:[#allocation5 + $0x60] sm:$0xff]  }
  0x4e   :  { %1006 = vmatprep.subr.bf16.mxu1 %v1129_v6  ;;  %v1136_v13 = vld [vmem:[#allocation5 + $0x18] sm:$0xff]   ;;  %v1140_v17 = vld [vmem:[#allocation5 + $0x20] sm:$0xff]   ;;  %v1143_v20 = vld [vmem:[#allocation5 + $0x68] sm:$0xff]  }
  0x4f   :  { %985 = vmatpush3.bf16.msra.mxu0 %v1128_v5  ;;  %v1137_v14 = vld [vmem:[#allocation5 + $0xd8] sm:$0xff]   ;;  %v1141_v18 = vld [vmem:[#allocation5 + $0xe0] sm:$0xff]   ;;  %v1144_v21 = vld [vmem:[#allocation5 + $0x28] sm:$0xff]  }
  0x50   :  { %986 = vmatprep.subr.bf16.mxu0 %v1131_v8  ;;  %v1138_v15 = vld [vmem:[#allocation5 + $0x98] sm:$0xff]   ;;  %v1142_v19 = vld [vmem:[#allocation5 + $0xa0] sm:$0xff]   ;;  %v1145_v22 = vld [vmem:[#allocation5 + $0xe8] sm:$0xff]  }
  0x51   :  { %1007 = vmatpush3.bf16.msra.mxu1 %v1130_v7  ;;  %v1146_v23 = vld [vmem:[#allocation5 + $0xa8] sm:$0xff]   ;;  %v1147_v24 = vld [vmem:[#allocation5 + $0x70] sm:$0xff]   ;;  %v1151_v28 = vld [vmem:[#allocation5 + $0x78] sm:$0xff]  }
  0x52   :  { %1008 = vmatprep.subr.bf16.mxu1 %v1133_v10  ;;  %v1148_v25 = vld [vmem:[#allocation5 + $0x30] sm:$0xff]   ;;  %v1152_v29 = vld [vmem:[#allocation5 + $0x38] sm:$0xff]   ;;  %v81_v34 = vld [vmem:[#allocation2] sm:$0xff] }
  0x53   :  { %987 = vmatpush3.bf16.msra.mxu0 %v1132_v9  ;;  %v1149_v26 = vld [vmem:[#allocation5 + $0xf0] sm:$0xff]   ;;  %v1153_v30 = vld [vmem:[#allocation5 + $0xf8] sm:$0xff]   ;;  %v88_v35 = vpack.c.bf16 %v81_v34, %v81_v34  ;;  %v1155_v36 = vld [vmem:[#allocation5 + $0x140] sm:$0xff]  }
  0x54   :  { %988 = vmatprep.subr.bf16.mxu0 %v1135_v12  ;;  %v1150_v27 = vld [vmem:[#allocation5 + $0xb0] sm:$0xff]   ;;  %v1154_v33 = vld [vmem:[#allocation5 + $0xb8] sm:$0xff]   ;;  %v84_v37 = vld [vmem:[#allocation2 + $0x18] sm:$0xff] }
  0x55   :  { %1009 = vmatpush3.bf16.msra.mxu1 %v1134_v11  ;;  %v82_v31 = vld [vmem:[#allocation2 + $0x8] sm:$0xff]  ;;  %v91_v38 = vpack.c.bf16 %v84_v37, %v84_v37  ;;  %v1156_v39 = vld [vmem:[#allocation5 + $0x100] sm:$0xff]   ;;  %v83_v40 = vld [vmem:[#allocation2 + $0x10] sm:$0xff] }
  0x56   :  { %1010 = vmatprep.subr.bf16.mxu1 %v1137_v14  ;;  %v89_v32 = vpack.c.bf16 %v82_v31, %v82_v31  ;;  %v90_v41 = vpack.c.bf16 %v83_v40, %v83_v40  ;;  %v1157_v42 = vld [vmem:[#allocation5 + $0x148] sm:$0xff]   ;;  %v1159_v45 = vld [vmem:[#allocation5 + $0x150] sm:$0xff]   ;;  %v1161_v47 = vld [vmem:[#allocation5 + $0x158] sm:$0xff]  }
  0x57   :  { %989 = vmatpush3.bf16.msra.mxu0 %v1136_v13  ;;  %570 = vmatprep.mubr.bf16.mxu1 %v91_v38  ;;  %v1158_v43 = vld [vmem:[#allocation5 + $0x108] sm:$0xff]   ;;  %v1160_v46 = vld [vmem:[#allocation5 + $0x110] sm:$0xff]   ;;  %v1162_v48 = vld [vmem:[#allocation5 + $0x118] sm:$0xff]  }
  0x58   :  { %990 = vmatprep.subr.bf16.mxu0 %v1139_v16  ;;  %530 = vmatprep.mubr.bf16.mxu0 %v89_v32  ;;  %v1163_v49 = vld [vmem:[#allocation5 + $0x160] sm:$0xff]   ;;  %v1165_v51 = vld [vmem:[#allocation5 + $0x168] sm:$0xff]   ;;  %v86_v54 = vld [vmem:[#allocation2 + $0x28] sm:$0xff] }
  0x59   :  { %1011 = vmatpush3.bf16.msra.mxu1 %v1138_v15  ;;  %v1164_v50 = vld [vmem:[#allocation5 + $0x120] sm:$0xff]   ;;  %v1166_v52 = vld [vmem:[#allocation5 + $0x128] sm:$0xff]   ;;  %v1167_v55 = vld [vmem:[#allocation5 + $0x170] sm:$0xff]   ;;  %v93_v56 = vpack.c.bf16 %v86_v54, %v86_v54 }
  0x5a   :  { %1012 = vmatprep.subr.bf16.mxu1 %v1141_v18  ;;  %v1171_v53 = vld [vmem:[#allocation5 + $0x180] sm:$0xff]   ;;  %v87_v57 = vld [vmem:[#allocation2 + $0x30] sm:$0xff]  ;;  %v1168_v59 = vld [vmem:[#allocation5 + $0x130] sm:$0xff]  }
  0x5b   :  { %991 = vmatpush3.bf16.msra.mxu0 %v1140_v17  ;;  %v94_v58 = vpack.c.bf16 %v87_v57, %v87_v57  ;;  %v1169_v60 = vld [vmem:[#allocation5 + $0x178] sm:$0xff]   ;;  %v85_v62 = vld [vmem:[#allocation2 + $0x20] sm:$0xff]  ;;  %v1173_v1 = vld [vmem:[#allocation7 + $0x8] sm:$0xff]  }
  0x5c   :  { %992 = vmatprep.subr.bf16.mxu0 %v1143_v20  ;;  %v1170_v61 = vld [vmem:[#allocation5 + $0x138] sm:$0xff]   ;;  %v92_v63 = vpack.c.bf16 %v85_v62, %v85_v62  ;;  %v1172_v0 = vld [vmem:[#allocation7] sm:$0xff]   ;;  %v1175_v3 = vld [vmem:[#allocation7 + $0x18] sm:$0xff]  }
  0x5d   :  { %1013 = vmatpush3.bf16.msra.mxu1 %v1142_v19  ;;  %v1174_v2 = vld [vmem:[#allocation7 + $0x10] sm:$0xff]   ;;  %v1176_v4 = vld [vmem:[#allocation7 + $0x20] sm:$0xff]   ;;  %v1177_v5 = vld [vmem:[#allocation7 + $0x28] sm:$0xff]  }
  0x5e   :  { %1014 = vmatprep.subr.bf16.mxu1 %v1145_v22  ;;  %v1178_v6 = vld [vmem:[#allocation7 + $0x30] sm:$0xff]   ;;  %v1179_v7 = vld [vmem:[#allocation7 + $0x38] sm:$0xff]   ;;  %v1180_v8 = vld [vmem:[#allocation8] sm:$0xff]  }
  0x5f   :  { %993 = vmatpush3.bf16.msra.mxu0 %v1144_v21  ;;  %v1181_v9 = vld [vmem:[#allocation8 + $0x8] sm:$0xff]   ;;  %v1182_v10 = vld [vmem:[#allocation8 + $0x10] sm:$0xff]   ;;  %v1183_v11 = vld [vmem:[#allocation8 + $0x18] sm:$0xff]  }
  0x60   :  { %994 = vmatprep.subr.bf16.mxu0 %v1147_v24  ;;  %v1184_v12 = vld [vmem:[#allocation8 + $0x20] sm:$0xff]   ;;  %v1185_v13 = vld [vmem:[#allocation8 + $0x28] sm:$0xff]   ;;  %v1186_v40 = vld [vmem:[#allocation8 + $0x30] sm:$0xff]  }
  0x61   :  { %1015 = vmatpush3.bf16.msra.mxu1 %v1146_v23  ;;  %v913_v15 = vld [vmem:[%s1462_s2] ss:$0 sm:$0xff] }
  0x62   :  { %1016 = vmatprep.subr.bf16.mxu1 %v1149_v26 }
  0x63   :  { %995 = vmatpush3.bf16.msra.mxu0 %v1148_v25 }
  0x64   :  { %996 = vmatprep.subr.bf16.mxu0 %v1151_v28 }
  0x65   :  { %1017 = vmatpush3.bf16.msra.mxu1 %v1150_v27 }
  0x66   :  { %1018 = vmatprep.subr.bf16.mxu1 %v1153_v30 }
  0x67   :  { %997 = vmatpush3.bf16.msra.mxu0 %v1152_v29 }
  0x68   :  { %1026 = vmatprep.subr.bf16.mxu0 %v1155_v36 }
  0x69   :  { %1019 = vmatpush3.bf16.msra.mxu1 %v1154_v33 }
  0x6a   :  { %531 = vmatmul.mubr.bf16.vlgmr.msra.gmra.mrb[0].mxu0 %v88_v35  ;;  %1068 = vmatprep.subr.bf16.mxu1 %v1316_v44 }
  0x6b   :  { %1027 = vmatpush3.bf16.msra.mxu0 %v1156_v39  ;;  %610 = vmatprep.mubr.bf16.mxu0 %v93_v56 }
  0x6c   :  { %571 = vmatmul.mubr.bf16.vlgmr.msra.gmra.mrb[0].mxu1 %v90_v41  ;;  %1028 = vmatprep.subr.bf16.mxu0 %v1157_v42  ;;  %v1187_v41 = vld [vmem:[#allocation8 + $0x38] sm:$0xff]   ;;  %v964_v42 = vld [vmem:[%s1464_s4] ss:$0 sm:$0xff]  ;;  %s1318_s4 = smov [#allocation10]  }
  0x6d   :  { %1070 = vmatprep.mubr.msk.bf16.mxu1 %vm1317_vm0, %v1316_v44  ;;  %1069 = vmatpush3.bf16.msra.mxu1 %v1171_v53  ;;  %s902_s28 = sshll.u32 %s1318_s4, 4  ;;  %s903_s28 = int_to_ptr.vmem [resolvable:$true] %s902_s28 }
  0x6e   :  { %1074 = vmatprep.subr.bf16.mxu1 %v1316_v44  ;;  %p1285_p5 = scmp.lt.s32.totalorder %s903_s28, %s903_s28 }
  0x6f   :  { %1029 = vmatpush3.bf16.msra.mxu0 %v1158_v43 }
  0x70   :  { %1030 = vmatprep.subr.bf16.mxu0 %v1159_v45 }
  0x73   :  { %1031 = vmatpush3.bf16.msra.mxu0 %v1160_v46 }
  0x74   :  { %1032 = vmatprep.subr.bf16.mxu0 %v1161_v47  ;;  %1071 = vmatmul.mubr.msk.bf16.vlgmr.msra.gmra.mrb[4].mxu1 %vm494_vm1, %v94_v58 }
  0x75   :  { %1090 = vmatprep.mubr.msk.bf16.mxu1 %vm1317_vm0, %v1316_v44  ;;  %1075 = vmatpush3.bf16.msra.mxu1 %v1172_v0 }
  0x76   :  { %1076 = vmatprep.subr.bf16.mxu1 %v1316_v44 }
  0x77   :  { %1033 = vmatpush3.bf16.msra.mxu0 %v1162_v48 }
  0x78   :  { %1034 = vmatprep.subr.bf16.mxu0 %v1163_v49 }
  0x79   :  { %1077 = vmatpush3.bf16.msra.mxu1 %v1173_v1 }
  0x7a   :  { %1078 = vmatprep.subr.bf16.mxu1 %v1316_v44 }
  0x7b   :  { %1035 = vmatpush3.bf16.msra.mxu0 %v1164_v50 }
  0x7c   :  { %1036 = vmatprep.subr.bf16.mxu0 %v1165_v51  ;;  %v973_v51 = vld [vmem:[%s1466_s6] ss:$0 sm:$0xff]  ;;  %s1280_s6 = scalar_lea.vmem %s903_s28, 64 }
  0x7d   :  { %1079 = vmatpush3.bf16.msra.mxu1 %v1174_v2  ;;  %p1281_p4 = scmp.ne.s32.totalorder %s903_s28, %s1280_s6  ;;  %p1286_p6 = scmp.lt.s32.totalorder %s1280_s6, %s1280_s6 }
  0x7e   :  { %1080 = vmatprep.subr.bf16.mxu1 %v1316_v44 }
  0x7f   :  { %1037 = vmatpush3.bf16.msra.mxu0 %v1166_v52  ;;  %p1287_p7 = por %p1286_p6, %p1285_p5 }
  0x80   :  { %1038 = vmatprep.subr.bf16.mxu0 %v1167_v55 }
  0x81   :  { %1081 = vmatpush3.bf16.msra.mxu1 %v1175_v3  ;;  %p1288_p8 = pnand %p1287_p7, %p1281_p4 }
  0x82   :  { %1082 = vmatprep.subr.bf16.mxu1 %v1316_v44 }
  0x83   :  { %1039 = vmatpush3.bf16.msra.mxu0 %v1168_v59 }
  0x84   :  { %1040 = vmatprep.subr.bf16.mxu0 %v1169_v60 }
  0x85   :  { %1083 = vmatpush3.bf16.msra.mxu1 %v1176_v4 }
  0x86   :  { %1084 = vmatprep.subr.bf16.mxu1 %v1316_v44 }
  0x87   :  { %1041 = vmatpush3.bf16.msra.mxu0 %v1170_v61 }
  0x88   :  { %1094 = vmatprep.subr.bf16.mxu0 %v1316_v44 }
  0x89   :  { %1085 = vmatpush3.bf16.msra.mxu1 %v1177_v5 }
  0x8a   :  { %611 = vmatmul.mubr.bf16.vlgmr.msra.gmra.mrb[4].mxu0 %v92_v63  ;;  %1086 = vmatprep.subr.bf16.mxu1 %v1316_v44 }
  0x8b   :  { %1110 = vmatprep.mubr.msk.bf16.mxu0 %vm1317_vm0, %v1316_v44  ;;  %1095 = vmatpush3.bf16.msra.mxu0 %v1180_v8 }
  0x8c   :  { %1096 = vmatprep.subr.bf16.mxu0 %v1316_v44 }
  0x8d   :  { %1087 = vmatpush3.bf16.msra.mxu1 %v1178_v6 }
  0x8e   :  { %1088 = vmatprep.subr.bf16.mxu1 %v1316_v44 }
  0x8f   :  { %1097 = vmatpush3.bf16.msra.mxu0 %v1181_v9 }
  0x90   :  { %1098 = vmatprep.subr.bf16.mxu0 %v1316_v44 }
  0x91   :  { %1089 = vmatpush3.bf16.msra.mxu1 %v1179_v7 }
  0x93   :  { %1099 = vmatpush3.bf16.msra.mxu0 %v1182_v10 }
  0x94   :  { %1100 = vmatprep.subr.bf16.mxu0 %v1316_v44 }
  0x97   :  { %1101 = vmatpush3.bf16.msra.mxu0 %v1183_v11 }
  0x98   :  { %1102 = vmatprep.subr.bf16.mxu0 %v1316_v44 }
  0x9b   :  { %1103 = vmatpush3.bf16.msra.mxu0 %v1184_v12 }
  0x9c   :  { %1104 = vmatprep.subr.bf16.mxu0 %v1316_v44 }
  0x9f   :  { %1105 = vmatpush3.bf16.msra.mxu0 %v1185_v13 }
  0xa0   :  { %1106 = vmatprep.subr.bf16.mxu0 %v1316_v44 }
  0xa3   :  { %1107 = vmatpush3.bf16.msra.mxu0 %v1186_v40 }
  0xa4   :  { %1108 = vmatprep.subr.bf16.mxu0 %v1316_v44 }
  0xa7   :  { %1109 = vmatpush3.bf16.msra.mxu0 %v1187_v41 }
 0x13d   :  { %v998_v14 = vpop.f32.mrb[0].mxu0 }
 0x13e   :  { %v999_v16 = vpop.f32.mrb[1].mxu0 }
 0x13f   :  { %v1000_v17 = vadd.f32 %v999_v16, %v998_v14  ;;  %v1001_v18 = vpop.f32.mrb[2].mxu0  ;;  %v1020_v19 = vpop.f32.mrb[0].mxu1 }
 0x140   :  { %v1002_v20 = vpop.f32.mrb[3].mxu0  ;;  %v1021_v22 = vpop.f32.mrb[1].mxu1 }
 0x141   :  { %v533_v21 = vadd.f32 %v1000_v17, %v913_v15  ;;  %v1022_v23 = vadd.f32 %v1021_v22, %v1020_v19  ;;  %v1023_v24 = vpop.f32.mrb[2].mxu1 }
 0x142   :  { %v1024_v25 = vpop.f32.mrb[3].mxu1 }
 0x143   :  { %v573_v26 = vadd.f32 %v1022_v23, %v533_v21 }
 0x147   :  { %v652_v27 = vpop.f32.mrb[4].mxu1 }
 0x148   :  { %v1072_v28 = vpop.f32.mrb[5].mxu1 }
 0x149   :  { %v655_v29 = vpop.f32.mrb[6].mxu1 }
 0x14a   :  { %v1073_v30 = vpop.f32.mrb[7].mxu1 }
 0x15d   :  { %v1042_v31 = vpop.f32.mrb[4].mxu0 }
 0x15e   :  { %v1043_v32 = vpop.f32.mrb[5].mxu0 }
 0x15f   :  { %v1044_v33 = vadd.f32 %v1043_v32, %v1042_v31  ;;  %v1045_v34 = vpop.f32.mrb[6].mxu0 }
 0x160   :  { %v1046_v35 = vpop.f32.mrb[7].mxu0 }
 0x161   :  { %v613_v36 = vadd.f32 %v1044_v33, %v573_v26 }
 0x163   :  { %v653_v37 = vadd.f32 %v652_v27, %v613_v36 }
 0x165   :  { %v658_v38 = vmax.f32 %v653_v37, 0.0 }
 0x167   :  { %v659_v39 = vpack.c.bf16 %v658_v38, %v658_v38 }
 0x169   :  { %1091 = vmatmul.mubr.bf16.vlgmr.msra.gmra.mrb[8].mxu1 %v659_v39 }
 0x23c   :  { %v765_v43 = vpop.f32.mrb[8].mxu1 }
 0x23d   :  { %v766_v45 = vadd.f32 %v964_v42, %v765_v43  ;;  %v1092_v46 = vpop.f32.mrb[9].mxu1 }
 0x23e   :  { %v768_v47 = vpop.f32.mrb[10].mxu1 }
 0x23f   :  { %v771_v48 = vmax.f32 %v766_v45, 0.0  ;;  %v1093_v49 = vpop.f32.mrb[11].mxu1 }
 0x241   :  { %v772_v50 = vpack.c.bf16 %v771_v48, %v771_v48 }
 0x243   :  { %1111 = vmatmul.mubr.bf16.vlgmr.msra.gmra.mrb[8].mxu0 %v772_v50 }
 0x316   :  { %v878_v52 = vpop.f32.mrb[8].mxu0 }
 0x317   :  { %v879_v44 = vadd.f32 %v973_v51, %v878_v52  ;;  %v1112_v53 = vpop.f32.mrb[9].mxu0 }
 0x318   :  { %v881_v54 = vpop.f32.mrb[10].mxu0 }
 0x319   :  { %884 = vmax.xlane.f32.xlu0 %v879_v44  ;;  %v1113_v55 = vpop.f32.mrb[11].mxu0 }
 0x3a6   :  { %v885_v56 = vpop.xlane.xlu0 %884 }
 0x3a7   :  { %v886_v57 = vsub.f32 %v879_v44, %v885_v56 }
 0x3a9   :  { %v887_v58 = vmul.f32 1.442695, %v886_v57 }
 0x3ab   :  { %1188 = vpow2.f32 %v887_v58 }
 0x3b5   :  { %v1189_v59 = vpop.eup %1188 }
 0x3b6   :  { %889 = vadd.xlane.f32.xlu0 %v1189_v59 }
 0x443   :  { %v890_v60 = vpop.xlane.xlu0 %889 }
 0x444   :  { %1190 = vlog2.f32 %v890_v60 }
 0x44e   :  { %v1191_v61 = vpop.eup %1190 }
 0x44f   :  { %v892_v62 = vmul.f32 0.6931472, %v1191_v61 }
 0x451   :  { %v893_v63 = vsub.f32 %v886_v57, %v892_v62 }
 0x453   :  { %v894_v0 = vpack.c.bf16 %v893_v63, %v893_v63 }
 0x455   :  { %895 = vst [vmem:[#allocation10] sm:$0xf] %v894_v0 }
 0x456   :  { %1291 = shalt.err (!%p1288_p8)
}
 0x457   :  { %s1292_s8 = scalar_lea.hbm %s1467_s7, 64 }
 0x458   :  { %p1293_p9 = scmp.ne.s32.totalorder %s1467_s7, %s1292_s8  ;;  %p1296_p10 = scmp.lt.u32.totalorder %s1292_s8, %s1467_s7 }
 0x45a   :  { %p1298_p11 = pnand %p1296_p10, %p1293_p9 }
 0x45c   :  { %1301 = shalt.err (!%p1298_p11)
}
 0x45d   :  { %905 = dma.vmem_to_hbm [thread:$0]  %s903_s28, 64, %s1467_s7, [#allocation4]  }
 0x45e   :  { %1308 = dma.done.wait [#allocation4], 64  }
 0x45f   :  { %1309 = vsyncadd [#allocation4], 4294967232 }
 0x460   :  { %909 = vsyncpa [#allocation3], 1 }
 0x461   :  { %910 = vsyncpa [#allocation6], 1 }
 0x462   :  { %911 = vsyncpa [#allocation9], 1 }
 0x463   :  { %912 = vsyncpa [#allocation4], 1 }

</bundles_post_ra>
